<compile_context>
chip_gen: v6e
topology: v6e:2x2x1
jax: 0.10.0
libtpu: 0.0.40
codegen_flags: <defaults>
</compile_context>

<pallas_src>
import functools

import jax
import jax.numpy as jnp
from jax import lax
from jax.experimental import pallas as pl
from jax.experimental.pallas import tpu as pltpu


def _round_up(x, m):
    return ((x + m - 1) // m) * m


def _pick_tile(full, target, align):
    """Largest multiple of `align` that divides `full` and is <= `target`.

    Used only for the Sf axis (fixed at 2048 by the module's max_length
    padding, so a divisor always exists).  Falls back to `full` (untiled)
    otherwise; a full-extent block always satisfies the (8, 128) constraint.
    """
    if full <= target:
        return full
    t = (target // align) * align
    while t >= align:
        if full % t == 0:
            return t
        t -= align
    return full


# ----------------------------------------------------------------------------
# Kernel A: ref_linear + softmax(dim=1)-attention-mix + residual.
# Grid: (B, Sf_tiles).  The softmax axis is S (fully resident), so Sf tiling is
# exact; the output block is resident across the Sf axis and doubles as the
# accumulator (seeded with the residual h on the first step).
# ----------------------------------------------------------------------------
def attn_mix_kernel(enc_ref, h_bf_ref, h_ref, w_ref, b_ref, out_ref):
    sf_idx = pl.program_id(1)

    @pl.when(sf_idx == 0)
    def _():
        out_ref[0] = h_ref[0]                 # seed accumulator with residual

    # (tsf, D) prompt-encoding tile; bf16 cast done in-kernel (VPU work hidden
    # under the streaming DMA) instead of a wrapper-side full-HBM cast pass.
    enc = enc_ref[0].astype(jnp.bfloat16)

    # att_tile = enc_tile @ W_ref + b_ref     (nn.Linear; bf16 MXU, f32 accum)
    att = jnp.dot(enc, w_ref[...], preferred_element_type=jnp.float32) + b_ref[...]
    att_bf = att.astype(jnp.bfloat16)

    # scores_tile = h @ att_tile^T -> (S, tsf); contract D directly (NT matmul,
    # no XLU transpose / VMEM copy of att).
    scores = lax.dot_general(
        h_bf_ref[0], att_bf,
        dimension_numbers=(((1,), (1,)), ((), ())),
        preferred_element_type=jnp.float32)

    # F.softmax(..., dim=1) on a (B, S, Sf) tensor == softmax over S (axis 0
    # here).  Each Sf column is independent, so the per-tile softmax is exact.
    m = jnp.max(scores, axis=0, keepdims=True)
    e = jnp.exp(scores - m)
    p = e * pl.reciprocal(jnp.sum(e, axis=0, keepdims=True), approx=True)

    # mixed += softmax(scores_tile) @ att_tile      (f32 accumulation over Sf)
    out_ref[0] += jnp.dot(p.astype(jnp.bfloat16), att_bf,
                          preferred_element_type=jnp.float32)


def attn_mix(enc_full, h, w_ref_t_bf16, b_ref_f32, *, sf_tile=1024):
    """enc_full: (B, Sf, D), h: (B, S, D), w_ref_t_bf16: (D, D), b_ref: (1, D)."""
    B, Sf, D = enc_full.shape
    _, S, _ = h.shape
    tsf = _pick_tile(Sf, sf_tile, 8)
    n_sf = Sf // tsf

    h_f32 = h.astype(jnp.float32)
    h_bf = h.astype(jnp.bfloat16)     # tiny (B,S,D); hoisted out of the Sf loop

    return pl.pallas_call(
        attn_mix_kernel,
        out_shape=jax.ShapeDtypeStruct((B, S, D), jnp.float32),
        grid=(B, n_sf),
        in_specs=[
            pl.BlockSpec((1, tsf, D), lambda b, s: (b, s, 0)),   # streamed enc tile
            pl.BlockSpec((1, S, D), lambda b, s: (b, 0, 0)),     # resident bf16 h
            pl.BlockSpec((1, S, D), lambda b, s: (b, 0, 0)),     # resident f32 h
            pl.BlockSpec((D, D), lambda b, s: (0, 0)),           # resident bf16 W
            pl.BlockSpec((1, D), lambda b, s: (0, 0)),           # bias
        ],
        out_specs=pl.BlockSpec((1, S, D), lambda b, s: (b, 0, 0)),
        compiler_params=pltpu.CompilerParams(
            dimension_semantics=("parallel", "arbitrary"),
            # D=1024, tsf=1024: ~12 MiB pipelined blocks + a few MiB of
            # intermediates; 32 MiB fits every generation (raises v5e's 16 MiB
            # scoped default, == default on v6e/v7x, < v7x's 64 MiB physical).
            vmem_limit_bytes=32 * 1024 * 1024),
    )(enc_full, h_bf, h_f32, w_ref_t_bf16, b_ref_f32)


# ----------------------------------------------------------------------------
# Kernel B: lm_head_layer — scale by model_dim**-0.5, linear (no bias).
# (B, T) flattened to M rows; grid only over vocab tiles so the (padded) bf16
# weight is streamed from HBM exactly once in large lane-dense tiles.
# ----------------------------------------------------------------------------
def lm_head_kernel(x_ref, w_ref, out_ref, *, scale):
    # (M, D) @ (D, tv) on the MXU, bf16 in / f32 accum; tied-embedding scale
    # applied on the f32 result (scalar multiply commutes with the matmul).
    out_ref[...] = scale * jnp.dot(x_ref[...], w_ref[...],
                                   preferred_element_type=jnp.float32)


def lm_head(seq_out, w_lm_padded_bf16, vocab_size, v_tile, model_dim):
    """seq_out: (B, T, D); w_lm_padded_bf16: (D, V_pad) with V_pad % v_tile == 0."""
    B, T, D = seq_out.shape
    V_pad = w_lm_padded_bf16.shape[1]
    tv = int(v_tile)
    n_v = V_pad // tv
    M = B * T
    scale = float(model_dim) ** -0.5

    x_bf = seq_out.reshape(M, D).astype(jnp.bfloat16)   # tiny; resident across V tiles

    # Double-buffered weight tiles + activations/output + headroom; capped so it
    # stays inside v7x's 64 MiB physical VMEM even for tv up to 4096.
    vmem_limit = min(max(32 << 20, 2 * D * tv * 2 + (8 << 20)), 56 << 20)

    out = pl.pallas_call(
        functools.partial(lm_head_kernel, scale=scale),
        out_shape=jax.ShapeDtypeStruct((M, V_pad), jnp.float32),
        grid=(n_v,),
        in_specs=[
            pl.BlockSpec((M, D), lambda v: (0, 0)),     # activations stay in VMEM
            # TODO(synk): if an xprof trace on v6e shows exposed DMA between
            # vocab steps, add pipeline_mode=pl.Buffered(3) on this spec.
            pl.BlockSpec((D, tv), lambda v: (0, v)),    # bf16 weight tile, streamed once
        ],
        out_specs=pl.BlockSpec((M, tv), lambda v: (0, v)),
        compiler_params=pltpu.CompilerParams(
            dimension_semantics=("parallel",),
            vmem_limit_bytes=vmem_limit),
    )(x_bf, w_lm_padded_bf16)
    # Drop the zero-padded vocab columns (cheap: M x V f32 copy).
    return out[:, :vocab_size].reshape(B, T, vocab_size)


# ----------------------------------------------------------------------------
# One-time parameter prep (init-time): bf16 casts of the big weights + vocab
# padding to a multiple of the vocab tile.  Removes the per-forward full-HBM
# cast pass over the ~64 MiB lm_head weight.
# ----------------------------------------------------------------------------
def prepare_params(raw_params, *, v_tile=2048):
    w_lm_t = raw_params["w_lm_t"]
    D, V = w_lm_t.shape
    tv = max(128, min(int(v_tile), _round_up(V, 128)))
    n_v = pl.cdiv(V, tv)
    v_pad = n_v * tv
    w_lm_bf = w_lm_t.astype(jnp.bfloat16)
    if v_pad != V:
        w_lm_bf = jnp.pad(w_lm_bf, ((0, 0), (0, v_pad - V)))
    return {
        "w_ref_t": raw_params["w_ref_t"].astype(jnp.bfloat16),
        "b_ref": raw_params["b_ref"].astype(jnp.float32),
        "w_lm_t_padded": w_lm_bf,
        "vocab_size": V,
        "v_tile": tv,
        "model_dim": raw_params["model_dim"],
    }


# ----------------------------------------------------------------------------
# Wrapper reproducing the implementable part of Net.forward (training branch).
# ----------------------------------------------------------------------------
def net_forward(enc_full, enc_note, dec_seq_out, prepared, *, sf_tile=1024):
    """Returns (mixed_hidden_state, output_decode_logits)."""
    att_mixed = attn_mix(enc_full, enc_note, prepared["w_ref_t"],
                         prepared["b_ref"], sf_tile=sf_tile)
    logits = lm_head(dec_seq_out, prepared["w_lm_t_padded"],
                     prepared["vocab_size"], prepared["v_tile"],
                     prepared["model_dim"])
    return att_mixed, logits


# ----------------------------------------------------------------------------
# References.
# ----------------------------------------------------------------------------
def reference_forward_f32(enc_full, enc_note, dec_seq_out, params):
    """Pure-JAX f32 reference mirroring the PyTorch semantics exactly."""
    att = jnp.einsum("bsd,de->bse", enc_full, params["w_ref_t"]) + params["b_ref"][0]
    scores = jnp.einsum("bqd,bkd->bqk", enc_note, att)
    p = jax.nn.softmax(scores, axis=1)                      # dim=1 !
    mixed = jnp.einsum("bqk,bkd->bqd", p, att) + enc_note
    logits = jnp.einsum(
        "btd,dv->btv", dec_seq_out * params["model_dim"] ** -0.5, params["w_lm_t"])
    return mixed, logits


def reference_forward_bf16(enc_full, enc_note, dec_seq_out, params):
    """Same math with bf16-in / f32-accum matmuls (matches kernel numerics)."""
    bf16, f32 = jnp.bfloat16, jnp.float32
    att = jnp.einsum("bsd,de->bse", enc_full.astype(bf16),
                     params["w_ref_t"].astype(bf16),
                     preferred_element_type=f32) + params["b_ref"][0]
    att_bf = att.astype(bf16)
    scores = jnp.einsum("bqd,bkd->bqk", enc_note.astype(bf16), att_bf,
                        preferred_element_type=f32)
    p = jax.nn.softmax(scores, axis=1)
    mixed = jnp.einsum("bqk,bkd->bqd", p.astype(bf16), att_bf,
                       preferred_element_type=f32) + enc_note
    logits = (params["model_dim"] ** -0.5) * jnp.einsum(
        "btd,dv->btv", dec_seq_out.astype(bf16), params["w_lm_t"].astype(bf16),
        preferred_element_type=f32)
    return mixed, logits


if __name__ == "__main__":
    # Small shapes (real model: D=768/1024, Sf=2048, V=32128).  V=500 is chosen
    # deliberately non-multiple-of-128 so the cdiv+pad vocab tiling path is
    # exercised; sf_tile=16 / v_tile=256 give 2 tiles along each tiled axis.
    B, Sf, S, T, D, V = 2, 32, 8, 8, 128, 500

    key = jax.random.PRNGKey(0)
    k1, k2, k3, k4, k5, k6 = jax.random.split(key, 6)

    enc_full = jax.random.normal(k1, (B, Sf, D), jnp.float32)   # encoder(vocab prompt)
    enc_note = jax.random.normal(k2, (B, S, D), jnp.float32)    # encoder(input note)
    dec_seq = jax.random.normal(k3, (B, T, D), jnp.float32)     # decoder sequence out

    params = {
        # nn.Linear(D, D): weight (D_out, D_in) -> stored pre-transposed (D_in, D_out)
        "w_ref_t": jax.random.normal(k4, (D, D), jnp.float32) * 0.05,
        "b_ref": jax.random.normal(k5, (1, D), jnp.float32) * 0.05,
        # lm_head weight (V, D) -> pre-transposed (D, V), no bias (T5)
        "w_lm_t": jax.random.normal(k6, (D, V), jnp.float32) * 0.05,
        "model_dim": D,
    }

    prepared = prepare_params(params, v_tile=256)   # init-time cast + pad
    mixed, logits = net_forward(enc_full, enc_note, dec_seq, prepared, sf_tile=16)
    jax.block_until_ready((mixed, logits))

    # Kernel matmuls are bf16-in / f32-accum, so the tight check is against a
    # bf16 reference; the comparison with the pure-f32 (PyTorch-equivalent)
    # reference uses a loosened tolerance, as expected for bf16 MXU inputs.
    # (pl.reciprocal(approx=True) adds ~1e-3 relative error to the softmax.)
    bf_mixed, bf_logits = reference_forward_bf16(enc_full, enc_note, dec_seq, params)
    f_mixed, f_logits = reference_forward_f32(enc_full, enc_note, dec_seq, params)

    assert jnp.allclose(mixed, bf_mixed, atol=3e-2, rtol=3e-2)
    assert jnp.allclose(logits, bf_logits, atol=3e-2, rtol=3e-2)
    assert jnp.allclose(mixed, f_mixed, atol=0.25, rtol=0.25)
    assert jnp.allclose(logits, f_logits, atol=0.25, rtol=0.25)

    print("KERNEL_OK")
</pallas_src>

<mosaic_0001>
module attributes {stable_mosaic.version = 11 : i64} {
  func.func @attn_mix_kernel(%arg0: i32, %arg1: i32, %arg2: memref<1x16x128xf32, #tpu.memory_space<vmem>>, %arg3: memref<1x8x128xbf16, #tpu.memory_space<vmem>>, %arg4: memref<1x8x128xf32, #tpu.memory_space<vmem>>, %arg5: memref<128x128xbf16, #tpu.memory_space<vmem>>, %arg6: memref<1x128xf32, #tpu.memory_space<vmem>>, %arg7: memref<1x8x128xf32, #tpu.memory_space<vmem>>) attributes {dimension_semantics = [#tpu.dimension_semantics<parallel>, #tpu.dimension_semantics<arbitrary>], iteration_bounds = array<i64: 2, 2>, scalar_prefetch = 0 : i64, scratch_operands = 0 : i64, tpu.core_type = #tpu.core_type<tc>, window_params = [{transform_indices = @transform_0, window_bounds = array<i64: 1, 16, 128>}, {transform_indices = @transform_1, window_bounds = array<i64: 1, 8, 128>}, {transform_indices = @transform_2, window_bounds = array<i64: 1, 8, 128>}, {pipeline_mode = #tpu.pipeline_mode<synchronous>, transform_indices = @transform_3, window_bounds = array<i64: 128, 128>}, {pipeline_mode = #tpu.pipeline_mode<synchronous>, transform_indices = @transform_4, window_bounds = array<i64: 1, 128>}, {transform_indices = @transform_5, window_bounds = array<i64: 1, 8, 128>}]} {
    %c0_i32 = arith.constant 0 : i32
    %0 = arith.cmpi eq, %arg1, %c0_i32 : i32
    %1 = arith.extui %0 : i1 to i32
    %c0_i32_0 = arith.constant 0 : i32
    %2 = arith.cmpi ne, %1, %c0_i32_0 : i32
    scf.if %2 {
      %c0_20 = arith.constant 0 : index
      %c0_21 = arith.constant 0 : index
      %c0_22 = arith.constant 0 : index
      %33 = vector.load %arg4[%c0_20, %c0_21, %c0_22] : memref<1x8x128xf32, #tpu.memory_space<vmem>>, vector<1x8x128xf32>
      %34 = vector.shape_cast %33 : vector<1x8x128xf32> to vector<8x128xf32>
      %c0_23 = arith.constant 0 : index
      %c0_24 = arith.constant 0 : index
      %c0_25 = arith.constant 0 : index
      %35 = vector.load %arg7[%c0_23, %c0_24, %c0_25] : memref<1x8x128xf32, #tpu.memory_space<vmem>>, vector<1x8x128xf32>
      %36 = vector.shape_cast %35 : vector<1x8x128xf32> to vector<8x128xf32>
      %37 = vector.shape_cast %34 : vector<8x128xf32> to vector<1x8x128xf32>
      tpu.vector_store %arg7[%c0_23, %c0_24, %c0_25], %37 {strides = array<i32>} : memref<1x8x128xf32, #tpu.memory_space<vmem>>, vector<1x8x128xf32>,
    } else {
    }
    %c0 = arith.constant 0 : index
    %c0_1 = arith.constant 0 : index
    %c0_2 = arith.constant 0 : index
    %3 = vector.load %arg2[%c0, %c0_1, %c0_2] : memref<1x16x128xf32, #tpu.memory_space<vmem>>, vector<1x16x128xf32>
    %4 = vector.shape_cast %3 : vector<1x16x128xf32> to vector<16x128xf32>
    %5 = arith.truncf %4 : vector<16x128xf32> to vector<16x128xbf16>
    %c0_3 = arith.constant 0 : index
    %c0_4 = arith.constant 0 : index
    %6 = vector.load %arg5[%c0_3, %c0_4] : memref<128x128xbf16, #tpu.memory_space<vmem>>, vector<128x128xbf16>
    %cst = arith.constant dense<0.000000e+00> : vector<16x128xf32>
    %7 = tpu.matmul %5, %6, %cst {dimension_numbers = #tpu.dot_dimension_numbers<[1], [0], [0], [1], [0, 0, 1, 1], [], []>} : vector<16x128xbf16>, vector<128x128xbf16>, vector<16x128xf32> -> vector<16x128xf32>
    %c0_5 = arith.constant 0 : index
    %c0_6 = arith.constant 0 : index
    %8 = vector.load %arg6[%c0_5, %c0_6] : memref<1x128xf32, #tpu.memory_space<vmem>>, vector<1x128xf32>
    %9 = vector.broadcast %8 : vector<1x128xf32> to vector<16x128xf32>
    %10 = arith.addf %7, %9 : vector<16x128xf32>
    %11 = arith.truncf %10 : vector<16x128xf32> to vector<16x128xbf16>
    %c0_7 = arith.constant 0 : index
    %c0_8 = arith.constant 0 : index
    %c0_9 = arith.constant 0 : index
    %12 = vector.load %arg3[%c0_7, %c0_8, %c0_9] : memref<1x8x128xbf16, #tpu.memory_space<vmem>>, vector<1x8x128xbf16>
    %13 = vector.shape_cast %12 : vector<1x8x128xbf16> to vector<8x128xbf16>
    %cst_10 = arith.constant dense<0.000000e+00> : vector<8x16xf32>
    %14 = tpu.matmul %13, %11, %cst_10 {dimension_numbers = #tpu.dot_dimension_numbers<[1], [1], [0], [0], [0, 0, 1, 0], [], []>} : vector<8x128xbf16>, vector<16x128xbf16>, vector<8x16xf32> -> vector<8x16xf32>
    %cst_11 = arith.constant dense<0xFF800000> : vector<16xf32>
    %15 = vector.multi_reduction <maximumf>, %14, %cst_11 [0] : vector<8x16xf32> to vector<16xf32>
    %16 = vector.shape_cast %15 : vector<16xf32> to vector<1x16xf32>
    %17 = vector.broadcast %16 : vector<1x16xf32> to vector<8x16xf32>
    %18 = arith.subf %14, %17 : vector<8x16xf32>
    %19 = math.exp %18 : vector<8x16xf32>
    %cst_12 = arith.constant dense<0.000000e+00> : vector<16xf32>
    %20 = vector.multi_reduction <add>, %19, %cst_12 [0] : vector<8x16xf32> to vector<16xf32>
    %21 = vector.shape_cast %20 : vector<16xf32> to vector<1x16xf32>
    %22 = tpu.reciprocal %21 {approx = true} : vector<1x16xf32> -> vector<1x16xf32>
    %23 = vector.broadcast %22 : vector<1x16xf32> to vector<8x16xf32>
    %24 = arith.mulf %19, %23 : vector<8x16xf32>
    %c0_13 = arith.constant 0 : index
    %c0_14 = arith.constant 0 : index
    %c0_15 = arith.constant 0 : index
    %25 = vector.load %arg7[%c0_13, %c0_14, %c0_15] : memref<1x8x128xf32, #tpu.memory_space<vmem>>, vector<1x8x128xf32>
    %26 = vector.shape_cast %25 : vector<1x8x128xf32> to vector<8x128xf32>
    %27 = arith.truncf %24 : vector<8x16xf32> to vector<8x16xbf16>
    %cst_16 = arith.constant dense<0.000000e+00> : vector<8x128xf32>
    %28 = tpu.matmul %27, %11, %cst_16 {dimension_numbers = #tpu.dot_dimension_numbers<[1], [0], [0], [1], [0, 0, 1, 1], [], []>} : vector<8x16xbf16>, vector<16x128xbf16>, vector<8x128xf32> -> vector<8x128xf32>
    %29 = arith.addf %26, %28 : vector<8x128xf32>
    %c0_17 = arith.constant 0 : index
    %c0_18 = arith.constant 0 : index
    %c0_19 = arith.constant 0 : index
    %30 = vector.load %arg7[%c0_17, %c0_18, %c0_19] : memref<1x8x128xf32, #tpu.memory_space<vmem>>, vector<1x8x128xf32>
    %31 = vector.shape_cast %30 : vector<1x8x128xf32> to vector<8x128xf32>
    %32 = vector.shape_cast %29 : vector<8x128xf32> to vector<1x8x128xf32>
    tpu.vector_store %arg7[%c0_17, %c0_18, %c0_19], %32 {strides = array<i32>} : memref<1x8x128xf32, #tpu.memory_space<vmem>>, vector<1x8x128xf32>,
    return
  }
  func.func @transform_0(%arg0: i32, %arg1: i32) -> (i32, i32, i32) {
    %c0_i32 = arith.constant 0 : i32
    %c0_i32_0 = arith.constant 0 : i32
    return %arg0, %arg1, %c0_i32 : i32, i32, i32
  }
  func.func @transform_1(%arg0: i32, %arg1: i32) -> (i32, i32, i32) {
    %c0_i32 = arith.constant 0 : i32
    %c0_i32_0 = arith.constant 0 : i32
    %c0_i32_1 = arith.constant 0 : i32
    return %arg0, %c0_i32, %c0_i32_0 : i32, i32, i32
  }
  func.func @transform_2(%arg0: i32, %arg1: i32) -> (i32, i32, i32) {
    %c0_i32 = arith.constant 0 : i32
    %c0_i32_0 = arith.constant 0 : i32
    %c0_i32_1 = arith.constant 0 : i32
    return %arg0, %c0_i32, %c0_i32_0 : i32, i32, i32
  }
  func.func @transform_3(%arg0: i32, %arg1: i32) -> (i32, i32) {
    %c0_i32 = arith.constant 0 : i32
    %c0_i32_0 = arith.constant 0 : i32
    %c0_i32_1 = arith.constant 0 : i32
    return %c0_i32, %c0_i32_0 : i32, i32
  }
  func.func @transform_4(%arg0: i32, %arg1: i32) -> (i32, i32) {
    %c0_i32 = arith.constant 0 : i32
    %c0_i32_0 = arith.constant 0 : i32
    %c0_i32_1 = arith.constant 0 : i32
    return %c0_i32, %c0_i32_0 : i32, i32
  }
  func.func @transform_5(%arg0: i32, %arg1: i32) -> (i32, i32, i32) {
    %c0_i32 = arith.constant 0 : i32
    %c0_i32_0 = arith.constant 0 : i32
    %c0_i32_1 = arith.constant 0 : i32
    return %arg0, %c0_i32, %c0_i32_0 : i32, i32, i32
  }
}

</mosaic_0001>

<bundles_post_ra>
// kernel: tpu_custom_call.1
= control target key start
LH: loop header
LB: loop body
LE: loop exit
PB: predicated region body
PF: predicated region fallthrough
CT: control target
= control target key end

     0   :  { %s1553_s0 = inlined_call_operand.hbm [shape: f32[2,32,128], index: 0, kind: input, shape index: {}]   ;;  %s1554_s1 = inlined_call_operand.hbm [shape: bf16[2,8,128], index: 1, kind: input, shape index: {}]   ;;  %s1555_s2 = inlined_call_operand.hbm [shape: f32[2,8,128], index: 2, kind: input, shape index: {}]   ;;  %s1556_s3 = inlined_call_operand.hbm [shape: bf16[128,128], index: 3, kind: input, shape index: {}]   ;;  %s1557_s4 = inlined_call_operand.vmem [shape: f32[1,128], index: 4, kind: input, shape index: {}]   ;;  %s1558_s5 = inlined_call_operand.hbm [shape: f32[2,8,128], index: 5, kind: output, shape index: {}]  }
   0x1   :  { %1577 = sst [smem:[#allocation26_spill]] %s1554_s1 }
   0x2   :  { %1578 = sst [smem:[#allocation27_spill]] %s1556_s3 }
   0x3   :  { %1579 = sst [smem:[#allocation28_spill]] %s1557_s4 }
   0x4   :  { %1580 = sst [smem:[#allocation29_spill]] %s1558_s5 }
   0x5   :  { %10 = vsyncpa [#allocation3], 0 }
   0x6   :  { %12 = vsyncpa [#allocation3 + $0x1], 0 }
   0x7   :  { %13 = vsyncpa [#allocation6], 0 }
   0x8   :  { %15 = vsyncpa [#allocation6 + $0x1], 0 }
   0x9   :  { %16 = vsyncpa [#allocation9], 0 }
   0xa   :  { %17 = vsyncpa [#allocation4], 0 }
   0xb   :  { %19 = vsyncpa [#allocation4 + $0x1], 0  ;;  %s1229_s18 = smov 0   ;;  %s1231_s19 = smov 0  }
   0xc   :  { %s1233_s20 = smov 0   ;;  %s1235_s21 = smov 0  }
   0xd   :  { %s1237_s22 = smov 0   ;;  %s1239_s23 = smov 0  }
   0xe   :  { %s1241_s24 = smov 0   ;;  %s1243_s25 = smov 0  }
   0xf   :  { %s1245_s26 = smov 0   ;;  %s1247_s27 = smov 0  }
  0x10   :  { %s1249_s28 = smov 0  }
  0x11 LB: > { %1581 = sst [smem:[#allocation15_spill]] %s1146_s18  ;;  %s1285_s29 = sadd.s32 4294967295, %s1186_s28   ;;  %s1186_s28 = sphi %s1249_s28, %s25_s28   ;;  %s1182_s27 = sphi %s1247_s27, %s1636_s27   ;;  %s1178_s26 = sphi %s1245_s26, %s1628_s26   ;;  %s1174_s25 = sphi %s1243_s25, %s1635_s25   ;;  %s1170_s24 = sphi %s1241_s24, %s1627_s24   ;;  %s1166_s23 = sphi %s1239_s23, %s1634_s23   ;;  %s1162_s22 = sphi %s1237_s22, %s1633_s22   ;;  %s1158_s21 = sphi %s1235_s21, %s1632_s21   ;;  %s1154_s20 = sphi %s1233_s20, %s1631_s20   ;;  %s1150_s19 = sphi %s1231_s19, %s1630_s19   ;;  %s1146_s18 = sphi %s1229_s18, %s1629_s18  }
  0x12   : > { %1582 = sst [smem:[#allocation16_spill]] %s1150_s19  ;;  %s729_s30 = sadd.s32 4294967294, %s1186_s28  }
  0x13   : > { %1583 = sst [smem:[#allocation17_spill]] %s1170_s24  ;;  %p53_p0 = scmp.ne.s32.totalorder %s1166_s23, %s1162_s22 }
  0x14   : > { %1584 = sst [smem:[#allocation18_spill]] %s1174_s25  ;;  %p54_p1 = scmp.eq.s32.totalorder %s1186_s28, 0 }
  0x15   : > { %1585 = sst [smem:[#allocation19_spill]] %s1178_s26  ;;  %p59_p2 = scmp.ne.s32.totalorder %s1162_s22, %s1158_s21 }
  0x16   : > { %1586 = sst [smem:[#allocation20_spill]] %s1186_s28  ;;  %p79_p3 = scmp.ne.s32.totalorder %s1154_s20, %s1150_s19 }
  0x17   : > { %1587 = sst [smem:[#allocation21_spill]] %s1285_s29  ;;  %p55_p4 = por %p54_p1, %p53_p0 }
  0x18   : > { %p85_p5 = scmp.ne.s32.totalorder %s1150_s19, %s1146_s18  ;;  %p1299_p6 = por %p79_p3, %p54_p1 }
  0x19   : > { %p177_p7 = scmp.eq.s32.totalorder %s1285_s29, 3  ;;  %p183_p8 = scmp.eq.s32.totalorder %s729_s30, 3 }
  0x1a   : > { %p838_p11 = scmp.lt.s32.totalorder %s1186_s28, 4  ;;  %s242_s11 = sand.u32 1, %s1186_s28  }
  0x1b   : > { %p1304_p9 = por %p177_p7, %p79_p3  ;;  %p1311_p10 = por %p183_p8, %p85_p5 }
  0x1c   : > { %s244_s12 = sand.u32 1, %s1154_s20   ;;  %p1318_p12 = pnand %p838_p11, %p55_p4 }
  0x1d   : > { %s1589_s9 = scalar_select %p1304_p9, 1, 0 }
  0x1e   : > { %s1591_s10 = scalar_select %p1311_p10, 1, 0 }
  0x1f   : > { %1590 = sst [smem:[#allocation22_spill]] %s1589_s9  ;;  %s737_s14 = sshll.u32 %s244_s12, 2 }
  0x20   : > { %1592 = sst [smem:[#allocation23_spill]] %s1591_s10  ;;  %s738_s15 = sshll.u32 %s1182_s27, 6 }
  0x21   : > { %s1594_s1 = sld [smem:[#allocation26_spill]]  ;;  %s246_s7 = scalar_lea.vmem [#allocation5], %s737_s14 }
  0x22   : > { %s253_s6 = sshll.u32 %s246_s7, 4  ;;  %p1328_p13 = pnand %p838_p11, %p1299_p6  ;;  %s254_s6 = int_to_ptr.vmem [resolvable:$true] %s253_s6 }
  0x23   : > { %s1332_s10 = sshll.u32 %s244_s12, 3  ;;  %s1334_s9 = scalar_lea.sflag [#allocation6], %s242_s11 }
  0x24   : > { %p1563_p0 = pneg %p1328_p13  ;;  %s961_s25 = scalar_lea.vmem %s254_s6, 64 }
  0x25   : > { %p962_p1 = scmp.ne.s32.totalorder %s254_s6, %s961_s25  ;;  %s1188_s7 = smov [#allocation5]  }
  0x26   : > { %s966_s8 = sshll.u32 %s1188_s7, 4  ;;  %s967_s8 = int_to_ptr.vmem [resolvable:$false] %s966_s8 }
  0x27   : > { %s251_s30 = scalar_lea.hbm %s1594_s1, %s738_s15  ;;  %p964_p3 = pnand %p962_p1, %p1563_p0 }
  0x28   : > { %s968_s14 = scalar_lea.vmem %s967_s8, 128  ;;  %p969_p6 = scmp.lt.s32.totalorder %s254_s6, %s967_s8 }
  0x29   : > { %p965_p4 = pneg %p964_p3  ;;  %p970_p7 = scmp.lt.s32.totalorder %s968_s14, %s961_s25 }
  0x2b   : > { %p971_p8 = por %p970_p7, %p969_p6 }
  0x2d   : > { %p972_p11 = pnand %p971_p8, %p965_p4 }
  0x2f   : > { %975 = shalt.err (!%p972_p11)
}
  0x30   : > { %829 = dma.hbm_to_vmem [thread:$0]  (!%p1328_p13), %s251_s30, 64, %s254_s6, %s1334_s9  }
  0x31   : > { %p60_p1 = scmp.eq.s32.totalorder %s1285_s29, 0  ;;  %p730_p3 = scmp.ge.s32.totalorder %s1186_s28, 1 }
  0x32   : > { %p190_p4 = scmp.lt.s32.totalorder %s1186_s28, 5  ;;  %s1189_s6 = smov [#allocation8]  }
  0x33   : > { %p1352_p6 = por %p60_p1, %p59_p2  ;;  %p1361_p7 = por %p85_p5, %p60_p1 }
  0x34   : > { %p1365_p8 = pnand %p730_p3, %p190_p4  ;;  %s202_s15 = sshll.u32 %s1189_s6, 4  ;;  %s203_s15 = int_to_ptr.vmem [resolvable:$true] %s202_s15 }
  0x35   : > { %s1596_s25 = scalar_select %p1352_p6, 1, 0 }
  0x36   : > { %s1597_s11 = scalar_select %p1361_p7, 1, 0 }
  0x37   : > { %p819_p11 = pneg %p1365_p8  ;;  %s34_s17 = sadd.s32 1, %s1178_s26 }
  0x38   : > { %1598 = sst [smem:[#allocation24_spill]] %s1597_s11  ;;  %p1380_p5 = scmp.ge.s32.totalorder %s34_s17, 2 }
  0x39   : > { %p1374_p2 = pnand %p819_p11, %p60_p1  ;;  %s987_s8 = scalar_lea.vmem %s203_s15, 1024 }
  0x3a   : > { %p988_p4 = scmp.ne.s32.totalorder %s203_s15, %s987_s8  ;;  %p995_p9 = scmp.lt.s32.totalorder %s203_s15, %s203_s15 }
  0x3b   : > { %p978_p3 = pneg %p1374_p2  ;;  %p996_p7 = scmp.lt.s32.totalorder %s987_s8, %s987_s8 }
  0x3d   : > { %p990_p0 = pnand %p988_p4, %p978_p3  ;;  %p997_p6 = por %p996_p7, %p995_p9 }
  0x3f   : > { %p991_p10 = pneg %p990_p0 }
  0x41   : > { %p998_p11 = pnand %p997_p6, %p991_p10 }
  0x43   : > { %1001 = shalt.err (!%p998_p11)
}
  0x44   : > { %s1190_s14 = smov 64   ;;  %s1191_s6 = smov 4  }
  0x45   : > { %s1602_s3 = sld [smem:[#allocation27_spill]]  ;;  %s1638_s17 = smov (%p1380_p5, %s34_s17), 0 }
  0x46   : > { %1603 = sst [smem:[#allocation25_spill]] %s1638_s17  ;;  %s1604_s8 = sadd.s32 1, %s1182_s27 }
  0x47   : > { %s1640_s8 = smov (!%p1380_p5, %s1604_s8), %s1182_s27  ;;  %s42_s1 = ssub.s32 %s1178_s26, %s1638_s17 }
  0x48   : > { %p39_p9 = scmp.ge.s32.totalorder %s1640_s8, 2  ;;  %s1605_s18 = sand.u32 1, %s1166_s23  }
  0x49   : > { %s733_s28 = sshll.u32 %s1605_s18, 4  ;;  %s734_s16 = sshll.u32 %s1178_s26, 1 }
  0x4a   : > { %s1642_s8 = smov (%p39_p9, %s1640_s8), 0  ;;  %s223_s21 = scalar_lea.vmem [#allocation2], %s733_s28 }
  0x4b   : > { %822 = dma.hbm_to_vmem [thread:$0]  (!%p1374_p2), %s1602_s3, 1024, %s203_s15, [#allocation9], %s1190_s14, %s1190_s14, %s1191_s6  }
  0x4c   : > { %s735_s15 = sshll.u32 %s1182_s27, 2  ;;  %s232_s30 = sshll.u32 %s223_s21, 4  ;;  %s233_s30 = int_to_ptr.vmem [resolvable:$true] %s232_s30 }
  0x4d   : > { %s41_s7 = ssub.s32 %s1182_s27, %s1642_s8  ;;  %s229_s14 = sadd.s32 %s735_s15, %s734_s16 }
  0x4e   : > { %s43_s6 = sor.u32 %s42_s1, %s41_s7  ;;  %p70_p10 = scmp.eq.s32.totalorder %s41_s7, 0 }
  0x4f   : > { %p44_p0 = scmp.eq.s32.totalorder %s43_s6, 0  ;;  %s736_s3 = sshll.u32 %s229_s14, 7 }
  0x50   : > { %s1606_s4 = sadd.s32 1, %s1154_s20  ;;  %s1607_s24 = sadd.s32 1, %s1166_s23 }
  0x51   : > { %s1413_s17 = scalar_select %p70_p10, %s1154_s20, %s1606_s4  }
  0x52   : > { %s1418_s18 = scalar_select %p44_p0, %s1166_s23, %s1607_s24  }
  0x53   : > { %s231_s19 = scalar_lea.hbm %s1553_s0, %s736_s3  ;;  %s1608_s29 = sand.u32 1, %s1166_s23  }
  0x54   : > { %s220_s28 = scalar_lea.sflag [#allocation3], %s1608_s29  ;;  %p1004_p6 = pneg %p1318_p12 }
  0x55   : > { %s1015_s16 = scalar_lea.vmem %s233_s30, 256  ;;  %s1192_s1 = smov [#allocation2]  }
  0x56   : > { %p1016_p7 = scmp.ne.s32.totalorder %s233_s30, %s1015_s16  ;;  %s1020_s15 = sshll.u32 %s1192_s1, 4  ;;  %s1021_s15 = int_to_ptr.vmem [resolvable:$false] %s1020_s15 }
  0x57   : > { %s1022_s4 = scalar_lea.vmem %s1021_s15, 512  ;;  %p1023_p3 = scmp.lt.s32.totalorder %s233_s30, %s1021_s15 }
  0x58   : > { %p1018_p2 = pnand %p1016_p7, %p1004_p6  ;;  %p1024_p4 = scmp.lt.s32.totalorder %s1022_s4, %s1015_s16 }
  0x5a   : > { %p1019_p5 = pneg %p1018_p2  ;;  %p1025_p11 = por %p1024_p4, %p1023_p3 }
  0x5c   : > { %p1026_p9 = pnand %p1025_p11, %p1019_p5 }
  0x5e   : > { %1029 = shalt.err (!%p1026_p9)
}
  0x5f   : > { %s1193_s24 = smov 128   ;;  %s1194_s3 = smov 8  }
  0x60   : > { %826 = dma.hbm_to_vmem [thread:$0]  (!%p1318_p12), %s231_s19, 256, %s233_s30, %s220_s28, %s1193_s24, %s1193_s24, %s1194_s3  }
  0x61   : > { %s740_s26 = sshll.u32 %s1182_s27, 7  ;;  %s264_s7 = scalar_lea.vmem [#allocation7], %s1332_s10 }
  0x62   : > { %s269_s21 = scalar_lea.hbm %s1555_s2, %s740_s26  ;;  %s271_s14 = sshll.u32 %s264_s7, 4  ;;  %s272_s14 = int_to_ptr.vmem [resolvable:$true] %s271_s14 }
  0x63   : > { %s1043_s6 = scalar_lea.vmem %s272_s14, 128  ;;  %p1609_p0 = pneg %p1328_p13 }
  0x64   : > { %p1044_p10 = scmp.ne.s32.totalorder %s272_s14, %s1043_s6  ;;  %s1195_s16 = smov [#allocation7]  }
  0x65   : > { %s1048_s1 = sshll.u32 %s1195_s16, 4  ;;  %s1049_s1 = int_to_ptr.vmem [resolvable:$false] %s1048_s1 }
  0x66   : > { %p1046_p6 = pnand %p1044_p10, %p1609_p0  ;;  %s1050_s15 = scalar_lea.vmem %s1049_s1, 256 }
  0x67   : > { %p1051_p2 = scmp.lt.s32.totalorder %s272_s14, %s1049_s1  ;;  %p1052_p12 = scmp.lt.s32.totalorder %s1050_s15, %s1043_s6 }
  0x68   : > { %p1047_p7 = pneg %p1046_p6 }
  0x69   : > { %p1053_p5 = por %p1052_p12, %p1051_p2 }
  0x6b   : > { %p1054_p3 = pnand %p1053_p5, %p1047_p7 }
  0x6d   : > { %1057 = shalt.err (!%p1054_p3)
}
  0x6e   : > { %832 = dma.hbm_to_vmem [thread:$0]  (!%p1328_p13), %s269_s21, 128, %s272_s14, %s1334_s9  }
  0x6f   : > { %280 = sbr.rel (%p1365_p8) target bundleno = 851 (0x353), region = 40  ;;  %s282_s19 = sand.u32 (!%p1365_p8), 1, %s1162_s22  }
  0x70   : > { %s1443_s10 = sshll.u32 (!%p1365_p8), %s282_s19, 4  ;;  %s283_s13 = scalar_lea.sflag (!%p1365_p8), [#allocation3], %s282_s19 }
  0x71   : > { %s286_s30 = scalar_lea.vmem (!%p1365_p8), [#allocation2], %s1443_s10  ;;  %p1610_p4 = scmp.ne.s32.totalorder (!%p1365_p8), %s1596_s25, 0 }
  0x74   : > { %1129 = dma.done.wait (%p1610_p4), %s283_s13, 256  }
  0x75   : > { %1131 = vsyncadd (%p1610_p4), %s283_s13, 4294967040  ;;  %s1611_s28 = sld [smem:[#allocation21_spill]] }
  0x76   : > { %s1612_s5 = sld [smem:[#allocation16_spill]] }
  0x77   : > { %s1613_s4 = sld [smem:[#allocation24_spill]] }
  0x7b   : > { %s291_s9 = sand.u32 1, %s1611_s28  }
  0x7c   : > { %s1452_s24 = sand.u32 1, %s1612_s5   ;;  %s292_s3 = scalar_lea.sflag [#allocation6], %s291_s9 }
  0x7d   : > { %s743_s12 = sshll.u32 %s1452_s24, 2  ;;  %p1614_p13 = scmp.ne.s32.totalorder %s1613_s4, 0 }
  0x7e   : > { %s1455_s26 = scalar_lea.vmem [#allocation5], %s743_s12 }
  0x7f   : > { %1133 = dma.done.wait (%p1614_p13), %s292_s3, 192  }
  0x80   : > { %1135 = vsyncadd (%p1614_p13), %s292_s3, 4294967104  ;;  %s744_s25 = sshll.u32 %s1452_s24, 3 }
  0x81   : > { %s304_s29 = scalar_lea.vmem [#allocation7], %s744_s25 }
  0x82   : > { %1137 = dma.done.wait (%p60_p1), [#allocation9], 1024  }
  0x83   : > { %1139 = vsyncadd (%p60_p1), [#allocation9], 4294966272  ;;  %s1466_s11 = scalar_lea.vmem [#allocation10], %s744_s25  ;;  %s1615_s21 = sld [smem:[#allocation17_spill]] }
  0x89   : > { %p747_p8 = scmp.ne.s32.totalorder %s1615_s21, 0 }
  0x8b   : > { %350 = sbr.rel (%p747_p8) target bundleno = 146 (0x92), region = 60 }
  0x90   : > { %v351_v0 = vld [vmem:[%s304_s29] sm:$0xff] }
  0x91   : > { %352 = vst [vmem:[%s1466_s11] sm:$0xff] %v351_v0 }
  0x92 PF: > { %v936_v1 = vld [vmem:[#allocation8 + $0x38] sm:$0xff]   ;;  %v1196_v2 = vmov 0.0   ;;  %v937_v3 = vld [vmem:[#allocation8 + $0x30] sm:$0xff]   ;;  %vm1197_vm0 = vmmov 0   ;;  %v938_v4 = vld [vmem:[#allocation8 + $0x28] sm:$0xff]   ;;  %s1616_s6 = sld [smem:[#allocation28_spill]] }
  0x93   : > { %775 = vmatprep.subr.bf16.mxu0 %v1196_v2  ;;  %795 = vmatprep.subr.bf16.mxu1 %v1196_v2  ;;  %v939_v5 = vld [vmem:[#allocation8 + $0x20] sm:$0xff]   ;;  %v940_v6 = vld [vmem:[#allocation8 + $0x18] sm:$0xff]   ;;  %v941_v7 = vld [vmem:[#allocation8 + $0x10] sm:$0xff]   ;;  %vm510_vm1 = vcmask 130048   ;;  %s1617_s16 = sld [smem:[#allocation18_spill]]  ;;  %s591_s19 = sshll.u32 %s1466_s11, 4  ;;  %s1492_s19 = int_to_ptr.vmem [resolvable:$true] %s591_s19 }
  0x94   : > { %776 = vmatpush3.bf16.msra.mxu0 %v936_v1  ;;  %791 = vmatprep.mubr.msk.bf16.mxu0 %vm1197_vm0, %v1196_v2  ;;  %v942_v8 = vld [vmem:[#allocation8 + $0x8] sm:$0xff]   ;;  %v943_v9 = vld [vmem:[#allocation8] sm:$0xff]   ;;  %s1618_s1 = sld [smem:[#allocation22_spill]]  ;;  %s578_s5 = scalar_lea.sflag [#allocation4], %s1452_s24 }
  0x95   : > { %777 = vmatprep.subr.bf16.mxu0 %v1196_v2  ;;  %797 = vmatprep.mubr.msk.bf16.mxu1 %vm1197_vm0, %v1196_v2  ;;  %v353_v10 = vld [vmem:[%s286_s30] sm:$0xff]  ;;  %v354_v11 = vld [vmem:[%s286_s30 + $0x8] sm:$0xff]  ;;  %s1619_s30 = sld [smem:[#allocation29_spill]]  ;;  %s1058_s4 = scalar_lea.vmem %s1492_s19, 128 }
  0x96   : > { %v355_v12 = vpack.c.bf16 %v354_v11, %v353_v10  ;;  %v469_v21 = vld [vmem:[%s1455_s26] sm:$0xf]  ;;  %p1059_p1 = scmp.ne.s32.totalorder %s1492_s19, %s1058_s4  ;;  %s1198_s9 = smov [#allocation10]  }
  0x97   : > { %s1062_s12 = sshll.u32 %s1198_s9, 4  ;;  %s1063_s12 = int_to_ptr.vmem [resolvable:$false] %s1062_s12 }
  0x98   : > { %778 = vmatpush3.bf16.msra.mxu0 %v937_v3  ;;  %v748_v14 = vld [vmem:[%s1616_s6] ss:$0 sm:$0xff]  ;;  %s1064_s3 = scalar_lea.vmem %s1063_s12, 256  ;;  %p1065_p0 = scmp.lt.s32.totalorder %s1492_s19, %s1063_s12 }
  0x99   : > { %779 = vmatprep.subr.bf16.mxu0 %v1196_v2  ;;  %v530_v46 = vld [vmem:[%s1466_s11] sm:$0xff]  ;;  %s759_s15 = sshll.u32 %s1617_s16, 7  ;;  %p1066_p6 = scmp.lt.s32.totalorder %s1064_s3, %s1058_s4 }
  0x9a   : > { %p1620_p11 = scmp.ne.s32.totalorder %s1618_s1, 0 }
  0x9b   : > { %s1490_s28 = scalar_lea.hbm %s1619_s30, %s759_s15  ;;  %p1067_p7 = por %p1066_p6, %p1065_p0 }
  0x9c   : > { %780 = vmatpush3.bf16.msra.mxu0 %v938_v4  ;;  %p1060_p9 = pnand %p1059_p1, %p1620_p11 }
  0x9d   : > { %781 = vmatprep.subr.bf16.mxu0 %v1196_v2 }
  0x9e   : > { %p1061_p10 = pneg %p1060_p9 }
  0xa0   : > { %782 = vmatpush3.bf16.msra.mxu0 %v939_v5  ;;  %p1068_p2 = pnand %p1067_p7, %p1061_p10 }
  0xa1   : > { %783 = vmatprep.subr.bf16.mxu0 %v1196_v2 }
  0xa4   : > { %784 = vmatpush3.bf16.msra.mxu0 %v940_v6 }
  0xa5   : > { %785 = vmatprep.subr.bf16.mxu0 %v1196_v2 }
  0xa8   : > { %786 = vmatpush3.bf16.msra.mxu0 %v941_v7 }
  0xa9   : > { %787 = vmatprep.subr.bf16.mxu0 %v1196_v2 }
  0xac   : > { %788 = vmatpush3.bf16.msra.mxu0 %v942_v8 }
  0xad   : > { %789 = vmatprep.subr.bf16.mxu0 %v1196_v2 }
  0xb0   : > { %790 = vmatpush3.bf16.msra.mxu0 %v943_v9 }
  0xb3   : > { %792 = vmatmul.mubr.bf16.vlgmr.msra.gmra.mxu0 %v355_v12 }
 0x173   : > { %v461_v13 = vpop.f32.mrf.mxu0 }
 0x174   : > { %v462_v17 = vadd.f32 %v748_v14, %v461_v13 }
 0x175   : > { %v793_v15 = vpop.f32.mrf.mxu0 }
 0x177   : > { %v464_v16 = vpop.f32.mrf.mxu0 }
 0x178   : > { %v465_v18 = vadd.f32 %v748_v14, %v464_v16 }
 0x179   : > { %v794_v19 = vpop.f32.mrf.mxu0 }
 0x17a   : > { %v468_v20 = vpack.c.bf16 %v465_v18, %v462_v17 }
 0x17c   : > { %796 = vmatpush3.bf16.xpose.msra.mxu1 %v468_v20 }
 0x17d   : > { %801 = vmatprep.subr.bf16.mxu1 %v1196_v2 }
 0x183   : > { %798 = vmatmul.mubr.bf16.vlgmr.msra.gmra.mxu1 %v469_v21 }
 0x184   : > { %802 = vmatpush3.bf16.msra.mxu1 %v468_v20  ;;  %803 = vmatprep.mubr.msk.bf16.mxu1 %vm1197_vm0, %v1196_v2 }
 0x243   : > { %v504_v22 = vpop.f32.mrf.mxu1 }
 0x244   : > { %v511_v23 = vsel %vm510_vm1, %v504_v22, -inf }
 0x245   : > { %v512_v24 = vrot.slane %v511_v23, 4  ;;  %v799_v25 = vpop.f32.mrf.mxu1 }
 0x247   : > { %v513_v26 = vmax.f32 %v511_v23, %v512_v24  ;;  %v507_v27 = vpop.f32.mrf.mxu1 }
 0x249   : > { %v514_v28 = vrot.slane %v513_v26, 2  ;;  %v800_v29 = vpop.f32.mrf.mxu1 }
 0x24b   : > { %v515_v30 = vmax.f32 %v513_v26, %v514_v28 }
 0x24d   : > { %v516_v31 = vrot.slane %v515_v30, 1 }
 0x24f   : > { %v517_v32 = vmax.f32 %v515_v30, %v516_v31 }
 0x251   : > { %v518_v33 = vsub.f32 %v504_v22, %v517_v32 }
 0x253   : > { %v519_v34 = vmul.f32 1.442695, %v518_v33 }
 0x255   : > { %944 = vpow2.f32 %v519_v34 }
 0x262   : > { %v945_v35 = vpop.eup %944 }
 0x263   : > { %v521_v36 = vsel %vm510_vm1, %v945_v35, 0.0 }
 0x264   : > { %v522_v37 = vrot.slane %v521_v36, 4 }
 0x266   : > { %v523_v38 = vadd.f32 %v522_v37, %v521_v36 }
 0x268   : > { %v524_v39 = vrot.slane %v523_v38, 2 }
 0x26a   : > { %v525_v40 = vadd.f32 %v524_v39, %v523_v38 }
 0x26c   : > { %v526_v41 = vrot.slane %v525_v40, 1 }
 0x26e   : > { %v527_v42 = vadd.f32 %v526_v41, %v525_v40 }
 0x270   : > { %946 = vrcp.f32 %v527_v42 }
 0x27d   : > { %v947_v43 = vpop.eup %946 }
 0x27e   : > { %v529_v44 = vmul.f32 %v947_v43, %v945_v35 }
 0x280   : > { %v531_v45 = vpack.c.bf16 %v529_v44, %v529_v44 }
 0x282   : > { %804 = vmatmul.mubr.msk.bf16.vlgmr.msra.gmra.mxu1 %vm510_vm1, %v531_v45 }
 0x342   : > { %v569_v47 = vpop.f32.mrf.mxu1 }
 0x343   : > { %v575_v48 = vadd.f32 %v569_v47, %v530_v46 }
 0x344   : > { %v805_v49 = vpop.f32.mrf.mxu1 }
 0x345   : > { %576 = vst [vmem:[%s1466_s11] sm:$0xff] %v575_v48 }
 0x346   : > { %v572_v50 = vpop.f32.mrf.mxu1 }
 0x347   : > { %1071 = shalt.err (!%p1068_p2)
}
 0x348   : > { %s1072_s26 = scalar_lea.hbm %s1490_s28, 128  ;;  %s1076_s29 = scalar_lea.hbm %s1619_s30, 256 }
 0x349   : > { %p1073_p12 = scmp.ne.s32.totalorder %s1490_s28, %s1072_s26  ;;  %p1077_p4 = scmp.lt.s32.totalorder %s1490_s28, %s1619_s30 }
 0x34a   : > { %p1078_p13 = scmp.lt.s32.totalorder %s1076_s29, %s1072_s26 }
 0x34b   : > { %p1074_p5 = pnand %p1073_p12, %p1620_p11 }
 0x34c   : > { %p1079_p8 = por %p1078_p13, %p1077_p4 }
 0x34d   : > { %p1075_p3 = pneg %p1074_p5 }
 0x34f   : > { %p1080_p1 = pnand %p1079_p8, %p1075_p3 }
 0x351   : > { %1083 = shalt.err (!%p1080_p1)
}
 0x352   : > { %817 = dma.vmem_to_hbm [thread:$0]  (%p1620_p11), %s1492_s19, 128, %s1490_s28, %s578_s5   ;;  %v806_v51 = vpop.f32.mrf.mxu1 }
 0x353 PF: > { %s1621_s7 = sld [smem:[#allocation20_spill]] }
 0x354   : > { %s1622_s14 = sld [smem:[#allocation15_spill]] }
 0x355   : > { %s1623_s6 = sld [smem:[#allocation23_spill]] }
 0x359   : > { %p840_p9 = scmp.ge.s32.totalorder %s1621_s7, 2 }
 0x35a   : > { %s603_s16 = sand.u32 1, %s1622_s14  }
 0x35b   : > { %p1624_p10 = scmp.ne.s32.totalorder %s1623_s6, 0  ;;  %s604_s15 = scalar_lea.sflag [#allocation4], %s603_s16 }
 0x35d   : > { %p834_p0 = pnand %p840_p9, %p1624_p10 }
 0x35f   : > { %p835_p6 = pneg %p834_p0 }
 0x361   : > { %1141 = dma.done.wait (%p835_p6), %s604_s15, 128  }
 0x362   : > { %1143 = vsyncadd (%p835_p6), %s604_s15, 4294967168  ;;  %s25_s28 = sadd.s32 1, %s1621_s7   ;;  %s1625_s1 = sld [smem:[#allocation16_spill]] }
 0x363   : > { %p22_p7 = scmp.ge.s32.totalorder %s25_s28, 6   ;;  %s1626_s10 = smov %s1418_s18 }
 0x364   : > { %s1627_s24 = sld [smem:[#allocation19_spill]]  ;;  %s1630_s19 = smov %s1154_s20 }
 0x365   : > { %s1628_s26 = sld [smem:[#allocation25_spill]]  ;;  %s1631_s20 = smov %s1413_s17 }
 0x366   : > { %s1632_s21 = smov %s1162_s22  ;;  %s1633_s22 = smov %s1166_s23 }
 0x367   : > { %s1634_s23 = smov %s1626_s10  ;;  %s1635_s25 = smov %s1182_s27 }
 0x368   : > { %s1629_s18 = smov %s1625_s1  ;;  %s1636_s27 = smov %s1642_s8 }
 0x369   :  { %24 = sbr.rel (!%p22_p7) target bundleno = 17 (0x11), region = 117 }
 0x36e   :  { %609 = vsyncpa [#allocation3], 1 }
 0x36f   :  { %611 = vsyncpa [#allocation3 + $0x1], 1 }
 0x370   :  { %612 = vsyncpa [#allocation6], 1 }
 0x371   :  { %614 = vsyncpa [#allocation6 + $0x1], 1 }
 0x372   :  { %615 = vsyncpa [#allocation9], 1 }
 0x373   :  { %616 = vsyncpa [#allocation4], 1 }
 0x374   :  { %618 = vsyncpa [#allocation4 + $0x1], 1 }

</bundles_post_ra>
